<compile_context>
chip_gen: v5e
topology: v5e:2x2
jax: 0.10.0
libtpu: 0.0.40
codegen_flags: <defaults>
</compile_context>

<pallas_src>
import functools
import math

import jax
import jax.numpy as jnp
from jax.experimental import pallas as pl
from jax.experimental.pallas import tpu as pltpu


# ---------------------------------------------------------------------------
# Buffer setup (glue, plain JAX) — matches the PyTorch __init__ exactly.
# ---------------------------------------------------------------------------
def make_positional_encoding_table(d_model: int, max_len: int = 5000) -> jnp.ndarray:
    """Builds the pe buffer as in PyTorch: shape (max_len, 1, d_model), float32."""
    position = jnp.arange(max_len, dtype=jnp.float32)[:, None]               # (L, 1)
    div_term = jnp.exp(
        jnp.arange(0, d_model, 2, dtype=jnp.float32) * (-math.log(10000.0) / d_model)
    )                                                                         # (D/2,)
    angles = position * div_term                                              # (L, D/2)
    pe = jnp.zeros((max_len, d_model), dtype=jnp.float32)
    pe = pe.at[:, 0::2].set(jnp.sin(angles))
    pe = pe.at[:, 1::2].set(jnp.cos(angles))
    return pe[:, None, :]                                                     # (L, 1, D)


def prepare_pe_for_kernel(pe_table: jnp.ndarray, dtype) -> jnp.ndarray:
    """One-time (model-init) squeeze + dtype cast: (L, 1, D) -> (L, D) in model dtype."""
    if pe_table.ndim == 3:
        pe_table = pe_table[:, 0, :]
    return pe_table.astype(dtype)


# ---------------------------------------------------------------------------
# Kernels
# ---------------------------------------------------------------------------
def _pe_add_kernel_3d(x_ref, pe_ref, o_ref):
    # x: (ts, B, D); pe: (ts, D) broadcast over the batch (sublane) axis — VPU only.
    o_ref[...] = (x_ref[...] + pe_ref[...][:, None, :]).astype(o_ref.dtype)


def _pe_add_kernel_flat(x_ref, pe_ref, o_ref):
    # x: (ts, B*D) lane-dense; pe: (ts, D) replicated across the batch in lanes (XLU).
    reps = x_ref.shape[-1] // pe_ref.shape[-1]          # = B (static)
    o_ref[...] = (x_ref[...] + jnp.tile(pe_ref[...], (1, reps))).astype(o_ref.dtype)


def _pe_add_dropout_kernel_3d(x_ref, pe_ref, bits_ref, o_ref, *, keep_threshold, scale):
    y = x_ref[...] + pe_ref[...][:, None, :]
    keep = bits_ref[...] < jnp.uint32(keep_threshold)    # single integer compare
    o_ref[...] = jnp.where(keep, y * scale, 0.0).astype(o_ref.dtype)


def _pe_add_dropout_kernel_flat(x_ref, pe_ref, bits_ref, o_ref, *, keep_threshold, scale):
    reps = x_ref.shape[-1] // pe_ref.shape[-1]
    y = x_ref[...] + jnp.tile(pe_ref[...], (1, reps))
    keep = bits_ref[...] < jnp.uint32(keep_threshold)
    o_ref[...] = jnp.where(keep, y * scale, 0.0).astype(o_ref.dtype)


# ---------------------------------------------------------------------------
# Tiling helper
# ---------------------------------------------------------------------------
def _sublane_multiple(itemsize: int) -> int:
    return {4: 8, 2: 16, 1: 32}.get(int(itemsize), 8)


def _pick_seq_tile(
    S: int,
    row_bytes: int,
    itemsize: int,
    target_bytes: int,
    *,
    min_steps: int = 4,
    min_block_bytes: int = 1 << 20,
) -> int:
    """Sublane-multiple seq tile, budget-capped; no S % ts == 0 requirement."""
    sub = _sublane_multiple(itemsize)
    # Largest sublane-multiple row count under the VMEM byte budget.
    budget_rows = max(sub, (target_bytes // max(row_bytes, 1)) // sub * sub)
    # Prefer >= min_steps grid steps (v7x megacore sharding + pipeline overlap) ...
    steps_rows = max(sub, pl.cdiv(pl.cdiv(S, min_steps), sub) * sub)
    # ... but never shrink blocks below ~min_block_bytes (per-step overhead).
    floor_rows = max(sub, (min_block_bytes // max(row_bytes, 1)) // sub * sub)
    ts = min(budget_rows, max(steps_rows, floor_rows))
    # Never exceed S rounded up to a sublane multiple.
    ts = min(ts, max(sub, pl.cdiv(S, sub) * sub))
    return int(ts)


# ---------------------------------------------------------------------------
# Wrapper
# ---------------------------------------------------------------------------
def positional_encoding(
    x: jnp.ndarray,
    pe: jnp.ndarray,
    *,
    p: float = 0.1,
    training: bool = False,
    rng: jax.Array | None = None,
    target_block_bytes: int = 4 << 20,
) -> jnp.ndarray:
    """Applies x + pe[:S] (+ optional train-mode inverted dropout) with a Pallas kernel."""
    S, B, D = x.shape
    dtype = x.dtype
    itemsize = jnp.dtype(dtype).itemsize

    # pe: accept either the raw (L, 1, D) buffer or a pre-prepared (L, D) table.
    pe2 = pe
    if pe2.ndim == 3:
        pe2 = pe2[:, 0, :]
    if pe2.dtype != dtype:
        pe2 = pe2.astype(dtype)
    assert pe2.shape[0] >= S and pe2.shape[-1] == D

    # Layout choice: flatten only when it actually makes the lane dim 128-dense.
    flat = (D % 128 != 0) and ((B * D) % 128 == 0)

    row_bytes = B * D * itemsize
    ts = _pick_seq_tile(S, row_bytes, itemsize, target_block_bytes)
    grid = (pl.cdiv(S, ts),)

    if flat:
        x_in = x.reshape(S, B * D)                         # free: trailing dims contiguous
        x_spec = pl.BlockSpec((ts, B * D), lambda i: (i, 0))
        bits_spec = pl.BlockSpec((ts, B * D), lambda i: (i, 0))
        out_shape = jax.ShapeDtypeStruct((S, B * D), dtype)
        kern_add, kern_drop = _pe_add_kernel_flat, _pe_add_dropout_kernel_flat
    else:
        x_in = x
        x_spec = pl.BlockSpec((ts, B, D), lambda i: (i, 0, 0))
        bits_spec = pl.BlockSpec((ts, B, D), lambda i: (i, 0, 0))
        out_shape = jax.ShapeDtypeStruct((S, B, D), dtype)
        kern_add, kern_drop = _pe_add_kernel_3d, _pe_add_dropout_kernel_3d
    pe_spec = pl.BlockSpec((ts, D), lambda i: (i, 0))
    out_spec = x_spec

    # VMEM budget: x + out (+ bits) double-buffered + pe, plus slack.
    use_dropout = training and p > 0.0
    blk_x = ts * row_bytes
    blk_pe = ts * D * itemsize
    blk_bits = ts * B * D * 4 if use_dropout else 0
    vmem_needed = 2 * (2 * blk_x + blk_pe + blk_bits) + (1 << 20)
    vmem_limit = int(min(max(vmem_needed, 32 << 20), 56 << 20))   # <= v7x 64 MiB physical
    cparams = pltpu.CompilerParams(
        dimension_semantics=("parallel",),
        vmem_limit_bytes=vmem_limit,
    )

    if not use_dropout:
        out = pl.pallas_call(
            kern_add,
            grid=grid,
            in_specs=[x_spec, pe_spec],
            out_specs=out_spec,
            out_shape=out_shape,
            compiler_params=cparams,
        )(x_in, pe2)
    else:
        keep_prob = 1.0 - float(p)
        keep_threshold = min(int(round(keep_prob * 4294967296.0)), 4294967295)
        if rng is None:
            rng = jax.random.PRNGKey(0)
        # TODO(synk): on real TPU the in-kernel hardware PRNG (pltpu.prng_seed /
        # prng_random_bits) would avoid this extra HBM read of the bits array.
        bits = jax.random.bits(rng, x_in.shape, dtype=jnp.uint32)
        out = pl.pallas_call(
            functools.partial(
                kern_drop, keep_threshold=keep_threshold, scale=1.0 / keep_prob
            ),
            grid=grid,
            in_specs=[x_spec, pe_spec, bits_spec],
            out_specs=out_spec,
            out_shape=out_shape,
            compiler_params=cparams,
        )(x_in, pe2, bits)

    return out.reshape(S, B, D)


# ---------------------------------------------------------------------------
# Main
# ---------------------------------------------------------------------------
if __name__ == "__main__":
    S, B, D = 8, 2, 32  # seq_len, batch, d_model (ntoken)
    key = jax.random.PRNGKey(0)
    x = jax.random.normal(key, (S, B, D), dtype=jnp.float32)

    pe_table = make_positional_encoding_table(D, max_len=5000)        # (5000, 1, 32)
    pe_prepared = prepare_pe_for_kernel(pe_table, x.dtype)            # once, at "init"

    # Pure-JAX reference (eval mode: dropout == identity).
    ref = x + pe_table[:S]

    # Eval-mode forward.
    out = positional_encoding(x, pe_prepared, p=0.1, training=False)
    out = jax.block_until_ready(out)
    assert out.shape == (S, B, D)
    assert jnp.allclose(out, ref, atol=1e-6, rtol=1e-6), "mismatch vs reference"

    # Train-mode forward: RNG stream is not bit-matched to torch, but every
    # kept element must equal ref / (1 - p) and dropped elements must be zero.
    p = 0.1
    out_tr = positional_encoding(
        x, pe_prepared, p=p, training=True, rng=jax.random.PRNGKey(123)
    )
    out_tr = jax.block_until_ready(out_tr)
    assert out_tr.shape == (S, B, D)
    scaled = ref / (1.0 - p)
    ok = jnp.all(
        jnp.isclose(out_tr, 0.0)
        | jnp.isclose(out_tr, scaled, atol=1e-5, rtol=1e-5)
    )
    assert bool(ok), "train-mode dropout values inconsistent with inverted dropout"

    print("KERNEL_OK")
</pallas_src>

<mosaic_0001>
module attributes {stable_mosaic.version = 11 : i64} {
  func.func @_pe_add_kernel_3d(%arg0: i32, %arg1: memref<8x2x32xf32, #tpu.memory_space<vmem>>, %arg2: memref<8x32xf32, #tpu.memory_space<vmem>>, %arg3: memref<8x2x32xf32, #tpu.memory_space<vmem>>) attributes {dimension_semantics = [#tpu.dimension_semantics<parallel>], iteration_bounds = array<i64: 1>, scalar_prefetch = 0 : i64, scratch_operands = 0 : i64, tpu.core_type = #tpu.core_type<tc>, window_params = [{transform_indices = @transform_0, window_bounds = array<i64: 8, 2, 32>}, {transform_indices = @transform_1, window_bounds = array<i64: 8, 32>}, {transform_indices = @transform_2, window_bounds = array<i64: 8, 2, 32>}]} {
    %c0 = arith.constant 0 : index
    %c0_0 = arith.constant 0 : index
    %c0_1 = arith.constant 0 : index
    %0 = vector.load %arg1[%c0, %c0_0, %c0_1] : memref<8x2x32xf32, #tpu.memory_space<vmem>>, vector<8x2x32xf32>
    %c0_2 = arith.constant 0 : index
    %c0_3 = arith.constant 0 : index
    %1 = vector.load %arg2[%c0_2, %c0_3] : memref<8x32xf32, #tpu.memory_space<vmem>>, vector<8x32xf32>
    %2 = vector.shape_cast %1 : vector<8x32xf32> to vector<8x1x32xf32>
    %3 = vector.broadcast %2 : vector<8x1x32xf32> to vector<8x2x32xf32>
    %4 = arith.addf %0, %3 : vector<8x2x32xf32>
    %c0_4 = arith.constant 0 : index
    %c0_5 = arith.constant 0 : index
    %c0_6 = arith.constant 0 : index
    %5 = vector.load %arg3[%c0_4, %c0_5, %c0_6] : memref<8x2x32xf32, #tpu.memory_space<vmem>>, vector<8x2x32xf32>
    tpu.vector_store %arg3[%c0_4, %c0_5, %c0_6], %4 {strides = array<i32>} : memref<8x2x32xf32, #tpu.memory_space<vmem>>, vector<8x2x32xf32>,
    return
  }
  func.func @transform_0(%arg0: i32) -> (i32, i32, i32) {
    %c0_i32 = arith.constant 0 : i32
    %c0_i32_0 = arith.constant 0 : i32
    %c0_i32_1 = arith.constant 0 : i32
    return %arg0, %c0_i32, %c0_i32_0 : i32, i32, i32
  }
  func.func @transform_1(%arg0: i32) -> (i32, i32) {
    %c0_i32 = arith.constant 0 : i32
    %c0_i32_0 = arith.constant 0 : i32
    return %arg0, %c0_i32 : i32, i32
  }
  func.func @transform_2(%arg0: i32) -> (i32, i32, i32) {
    %c0_i32 = arith.constant 0 : i32
    %c0_i32_0 = arith.constant 0 : i32
    %c0_i32_1 = arith.constant 0 : i32
    return %arg0, %c0_i32, %c0_i32_0 : i32, i32, i32
  }
}

</mosaic_0001>

<bundles_post_ra>
// kernel: tpu_custom_call.1
= control target key start
LH: loop header
LB: loop body
LE: loop exit
PB: predicated region body
PF: predicated region fallthrough
CT: control target
= control target key end

     0   :  { %vm53_vm0 = vcmask 254976   ;;  %s165_s0 = inlined_call_operand.vmem [shape: f32[8,2,32], index: 0, kind: input, shape index: {}]   ;;  %s166_s1 = inlined_call_operand.vmem [shape: f32[5000,32], index: 1, kind: input, shape index: {}]   ;;  %s167_s2 = inlined_call_operand.hbm [shape: f32[8,2,32], index: 2, kind: output, shape index: {}]  }
   0x1   :  { %v12_v0 = vld [vmem:[%s165_s0] sm:$0x3]  ;;  %v13_v2 = vld [vmem:[%s165_s0 + $0x2] sm:$0x3]  ;;  %v14_v5 = vld [vmem:[%s165_s0 + $0x4] sm:$0x3] }
   0x2   :  { %v20_v1 = vld [vmem:[%s166_s1] sm:$0xff]  ;;  %v16_v9 = vld [vmem:[%s165_s0 + $0x8] sm:$0x3]  ;;  %v17_v16 = vld [vmem:[%s165_s0 + $0xa] sm:$0x3] }
   0x3   :  { %v29_v3 = vperm.slane %v20_v1, 0  ;;  %v22_v4 = vrot.slane %v20_v1, 1  ;;  %v23_v6 = vrot.slane %v20_v1, 2  ;;  %v24_v7 = vrot.slane %v20_v1, 3  ;;  %v15_v8 = vld [vmem:[%s165_s0 + $0x6] sm:$0x3] }
   0x4   :  { %v25_v10 = vrot.slane %v20_v1, 4  ;;  %v26_v11 = vrot.slane %v20_v1, 5  ;;  %v27_v19 = vrot.slane %v20_v1, 6  ;;  %v28_v20 = vrot.slane %v20_v1, 7  ;;  %v18_v24 = vld [vmem:[%s165_s0 + $0xc] sm:$0x3] }
   0x5   :  { %v45_v12 = vadd.f32 %v29_v3, %v12_v0  ;;  %v30_v13 = vperm.slane %v22_v4, 0  ;;  %v31_v14 = vperm.slane %v23_v6, 0  ;;  %v32_v15 = vperm.slane %v24_v7, 0 }
   0x6   :  { %v33_v17 = vperm.slane %v25_v10, 0  ;;  %v34_v18 = vperm.slane %v26_v11, 0 }
   0x7   :  { %54 = vst.msk [vmem:[#allocation2] sm:$0x3] %vm53_vm0, %v45_v12  ;;  %v46_v21 = vadd.f32 %v30_v13, %v13_v2  ;;  %v47_v22 = vadd.f32 %v31_v14, %v14_v5  ;;  %v48_v23 = vadd.f32 %v32_v15, %v15_v8 }
   0x8   :  { %7 = vsyncpa [#allocation3], 0  ;;  %v49_v25 = vadd.f32 %v33_v17, %v16_v9  ;;  %v35_v26 = vperm.slane %v27_v19, 0  ;;  %v19_v27 = vld [vmem:[%s165_s0 + $0xe] sm:$0x3]  ;;  %v36_v28 = vperm.slane %v28_v20, 0  ;;  %v50_v29 = vadd.f32 %v34_v18, %v17_v16 }
   0x9   :  { %55 = vst.msk [vmem:[#allocation2 + $0x2] sm:$0x3] %vm53_vm0, %v46_v21  ;;  %s109_s26 = smov [#allocation2]   ;;  %s68_s30 = sshll.u32 %s167_s2, 4  ;;  %s69_s30 = int_to_ptr.hbm [resolvable:$true] %s68_s30 }
   0xa   :  { %s66_s27 = sshll.u32 %s109_s26, 4  ;;  %56 = vst.msk [vmem:[#allocation2 + $0x4] sm:$0x3] %vm53_vm0, %v47_v22  ;;  %v51_v30 = vadd.f32 %v35_v26, %v18_v24  ;;  %v52_v31 = vadd.f32 %v36_v28, %v19_v27  ;;  %s110_s0 = smov 32   ;;  %s67_s27 = int_to_ptr.vmem [resolvable:$true] %s66_s27 }
   0xb   :  { %57 = vst.msk [vmem:[#allocation2 + $0x6] sm:$0x3] %vm53_vm0, %v48_v23  ;;  %s111_s3 = smov 2  }
   0xc   :  { %58 = vst.msk [vmem:[#allocation2 + $0x8] sm:$0x3] %vm53_vm0, %v49_v25 }
   0xd   :  { %59 = vst.msk [vmem:[#allocation2 + $0xa] sm:$0x3] %vm53_vm0, %v50_v29 }
   0xe   :  { %60 = vst.msk [vmem:[#allocation2 + $0xc] sm:$0x3] %vm53_vm0, %v51_v30 }
   0xf   :  { %61 = vst.msk [vmem:[#allocation2 + $0xe] sm:$0x3] %vm53_vm0, %v52_v31 }
  0x10   :  { %74 = dma.vmem_to_hbm [thread:$0]  %s67_s27, 256, %s69_s30, [#allocation3], %s110_s0, %s110_s0, %s111_s3  }
  0x11   :  { %107 = dma.done.wait [#allocation3], 256  }
  0x12   :  { %108 = vsyncadd [#allocation3], 4294967040 }
  0x13   :  { %79 = vsyncpa [#allocation3], 1 }

</bundles_post_ra>
